<compile_context>
chip_gen: v7x
topology: tpu7x:2x2x1
jax: 0.10.0
libtpu: 0.0.40
codegen_flags: <defaults>
</compile_context>

<pallas_src>
import jax
import jax.numpy as jnp
from jax.experimental import pallas as pl
from jax.experimental.pallas import tpu as pltpu

IN_F = 64
HID_F = 128
OUT_F = 256

# Batch tile: big enough to amortize the ~600-cycle per-step overhead, small enough that
# the fused two-dot body (f32 intermediate (TB,128)) doesn't spill vregs and the
# double-buffered x/out tiles fit comfortably inside v7x's 64 MiB VMEM.
DEFAULT_BLOCK_B = 256


def mlp_kernel(x_ref, w1_ref, b1_ref, w2_ref, b2_ref, o_ref):
    x = x_ref[...]
    w1 = w1_ref[...]
    w2 = w2_ref[...]
    # First linear: (TB, 64) @ (64, 128) + (1, 128)   -> f32 accumulate on the MXU
    h = jnp.dot(x, w1, preferred_element_type=jnp.float32) + b1_ref[...]
    # Second linear: (TB, 128) @ (128, 256) + (1, 256)
    y = jnp.dot(h.astype(w2.dtype), w2, preferred_element_type=jnp.float32) + b2_ref[...]
    o_ref[...] = y.astype(o_ref.dtype)


def _round_up(n, m):
    return ((n + m - 1) // m) * m


def simple_model_forward(x, w1, b1, w2, b2, *, block_b=DEFAULT_BLOCK_B, use_bf16=False):
    """x: (B, 64) f32; w1: (64, 128); b1: (1, 128); w2: (128, 256); b2: (1, 256)."""
    B = x.shape[0]

    # Tile size: multiple of 8 (sublane rule), no larger than needed for small batches.
    tb = min(block_b, _round_up(B, 8))
    Bp = _round_up(B, tb)
    if Bp != B:
        x = jnp.pad(x, ((0, Bp - B), (0, 0)))

    if use_bf16:
        # Optional: feed the MXU bf16 inputs (full-rate on v6e/v7x, fewer passes on v5e,
        # half the HBM bytes). Accumulation stays f32; output stays f32.
        x = x.astype(jnp.bfloat16)
        w1 = w1.astype(jnp.bfloat16)
        w2 = w2.astype(jnp.bfloat16)

    grid = (Bp // tb,)

    out = pl.pallas_call(
        mlp_kernel,
        out_shape=jax.ShapeDtypeStruct((Bp, OUT_F), jnp.float32),
        grid_spec=pl.GridSpec(
            grid=grid,
            in_specs=[
                # Streamed per grid step.
                pl.BlockSpec((tb, IN_F), lambda i: (i, 0)),
                # Weights / biases: same block every step -> stay VMEM-resident.
                pl.BlockSpec((IN_F, HID_F), lambda i: (0, 0)),
                pl.BlockSpec((1, HID_F), lambda i: (0, 0)),
                pl.BlockSpec((HID_F, OUT_F), lambda i: (0, 0)),
                pl.BlockSpec((1, OUT_F), lambda i: (0, 0)),
            ],
            out_specs=pl.BlockSpec((tb, OUT_F), lambda i: (i, 0)),
        ),
        compiler_params=pltpu.CompilerParams(
            # Independent batch tiles: shard across TensorCores on v7x.
            dimension_semantics=("parallel",),
            # Explicit, conservative scoped-VMEM budget (fits 64 MiB v7x parts).
            vmem_limit_bytes=32 * 1024 * 1024,
        ),
    )(x, w1, b1, w2, b2)

    return out[:B] if Bp != B else out


def init_params(key):
    """Deterministic init mimicking PyTorch nn.Linear default (uniform +-1/sqrt(fan_in))."""
    k1, k2, k3, k4 = jax.random.split(key, 4)
    bound1 = 1.0 / jnp.sqrt(jnp.float32(IN_F))
    bound2 = 1.0 / jnp.sqrt(jnp.float32(HID_F))
    # Stored as (in, out) = W^T relative to PyTorch's (out, in).
    w1 = jax.random.uniform(k1, (IN_F, HID_F), jnp.float32, -bound1, bound1)
    b1 = jax.random.uniform(k2, (1, HID_F), jnp.float32, -bound1, bound1)
    w2 = jax.random.uniform(k3, (HID_F, OUT_F), jnp.float32, -bound2, bound2)
    b2 = jax.random.uniform(k4, (1, OUT_F), jnp.float32, -bound2, bound2)
    return w1, b1, w2, b2


if __name__ == "__main__":
    key = jax.random.PRNGKey(0)
    kx, kx2, kp = jax.random.split(key, 3)

    w1, b1, w2, b2 = init_params(kp)

    # Small batch (single grid step).
    batch = 8
    x = jax.random.normal(kx, (batch, IN_F), jnp.float32)
    out = jax.block_until_ready(simple_model_forward(x, w1, b1, w2, b2))
    ref = (x @ w1 + b1) @ w2 + b2
    assert out.shape == (batch, OUT_F)
    assert jnp.allclose(out, ref, atol=1e-4, rtol=1e-4)

    # Ragged batch exercising the tiled / padded multi-step path.
    batch2 = 520  # not a multiple of the 256-row tile
    x2 = jax.random.normal(kx2, (batch2, IN_F), jnp.float32)
    out2 = jax.block_until_ready(simple_model_forward(x2, w1, b1, w2, b2))
    ref2 = (x2 @ w1 + b1) @ w2 + b2
    assert out2.shape == (batch2, OUT_F)
    assert jnp.allclose(out2, ref2, atol=1e-4, rtol=1e-4)

    print("KERNEL_OK")
</pallas_src>

<mosaic_0001>
module attributes {stable_mosaic.version = 11 : i64} {
  func.func @mlp_kernel(%arg0: i32, %arg1: memref<8x64xf32, #tpu.memory_space<vmem>>, %arg2: memref<64x128xf32, #tpu.memory_space<vmem>>, %arg3: memref<1x128xf32, #tpu.memory_space<vmem>>, %arg4: memref<128x256xf32, #tpu.memory_space<vmem>>, %arg5: memref<1x256xf32, #tpu.memory_space<vmem>>, %arg6: memref<8x256xf32, #tpu.memory_space<vmem>>) attributes {dimension_semantics = [#tpu.dimension_semantics<parallel>], iteration_bounds = array<i64: 1>, scalar_prefetch = 0 : i64, scratch_operands = 0 : i64, tpu.core_type = #tpu.core_type<tc>, window_params = [{transform_indices = @transform_0, window_bounds = array<i64: 8, 64>}, {pipeline_mode = #tpu.pipeline_mode<synchronous>, transform_indices = @transform_1, window_bounds = array<i64: 64, 128>}, {pipeline_mode = #tpu.pipeline_mode<synchronous>, transform_indices = @transform_2, window_bounds = array<i64: 1, 128>}, {pipeline_mode = #tpu.pipeline_mode<synchronous>, transform_indices = @transform_3, window_bounds = array<i64: 128, 256>}, {pipeline_mode = #tpu.pipeline_mode<synchronous>, transform_indices = @transform_4, window_bounds = array<i64: 1, 256>}, {transform_indices = @transform_5, window_bounds = array<i64: 8, 256>}]} {
    %c0 = arith.constant 0 : index
    %c0_0 = arith.constant 0 : index
    %0 = vector.load %arg1[%c0, %c0_0] : memref<8x64xf32, #tpu.memory_space<vmem>>, vector<8x64xf32>
    %c0_1 = arith.constant 0 : index
    %c0_2 = arith.constant 0 : index
    %1 = vector.load %arg2[%c0_1, %c0_2] : memref<64x128xf32, #tpu.memory_space<vmem>>, vector<64x128xf32>
    %c0_3 = arith.constant 0 : index
    %c0_4 = arith.constant 0 : index
    %2 = vector.load %arg4[%c0_3, %c0_4] : memref<128x256xf32, #tpu.memory_space<vmem>>, vector<128x256xf32>
    %cst = arith.constant dense<0.000000e+00> : vector<8x128xf32>
    %3 = tpu.matmul %0, %1, %cst {dimension_numbers = #tpu.dot_dimension_numbers<[1], [0], [0], [1], [0, 0, 1, 1], [], []>} : vector<8x64xf32>, vector<64x128xf32>, vector<8x128xf32> -> vector<8x128xf32>
    %c0_5 = arith.constant 0 : index
    %c0_6 = arith.constant 0 : index
    %4 = vector.load %arg3[%c0_5, %c0_6] : memref<1x128xf32, #tpu.memory_space<vmem>>, vector<1x128xf32>
    %5 = vector.broadcast %4 : vector<1x128xf32> to vector<8x128xf32>
    %6 = arith.addf %3, %5 : vector<8x128xf32>
    %cst_7 = arith.constant dense<0.000000e+00> : vector<8x256xf32>
    %7 = tpu.matmul %6, %2, %cst_7 {dimension_numbers = #tpu.dot_dimension_numbers<[1], [0], [0], [1], [0, 0, 1, 1], [], []>} : vector<8x128xf32>, vector<128x256xf32>, vector<8x256xf32> -> vector<8x256xf32>
    %c0_8 = arith.constant 0 : index
    %c0_9 = arith.constant 0 : index
    %8 = vector.load %arg5[%c0_8, %c0_9] : memref<1x256xf32, #tpu.memory_space<vmem>>, vector<1x256xf32>
    %9 = vector.broadcast %8 : vector<1x256xf32> to vector<8x256xf32>
    %10 = arith.addf %7, %9 : vector<8x256xf32>
    %c0_10 = arith.constant 0 : index
    %c0_11 = arith.constant 0 : index
    %11 = vector.load %arg6[%c0_10, %c0_11] : memref<8x256xf32, #tpu.memory_space<vmem>>, vector<8x256xf32>
    tpu.vector_store %arg6[%c0_10, %c0_11], %10 {strides = array<i32>} : memref<8x256xf32, #tpu.memory_space<vmem>>, vector<8x256xf32>,
    return
  }
  func.func @transform_0(%arg0: i32) -> (i32, i32) {
    %c0_i32 = arith.constant 0 : i32
    %c0_i32_0 = arith.constant 0 : i32
    return %arg0, %c0_i32 : i32, i32
  }
  func.func @transform_1(%arg0: i32) -> (i32, i32) {
    %c0_i32 = arith.constant 0 : i32
    %c0_i32_0 = arith.constant 0 : i32
    %c0_i32_1 = arith.constant 0 : i32
    return %c0_i32, %c0_i32_0 : i32, i32
  }
  func.func @transform_2(%arg0: i32) -> (i32, i32) {
    %c0_i32 = arith.constant 0 : i32
    %c0_i32_0 = arith.constant 0 : i32
    %c0_i32_1 = arith.constant 0 : i32
    return %c0_i32, %c0_i32_0 : i32, i32
  }
  func.func @transform_3(%arg0: i32) -> (i32, i32) {
    %c0_i32 = arith.constant 0 : i32
    %c0_i32_0 = arith.constant 0 : i32
    %c0_i32_1 = arith.constant 0 : i32
    return %c0_i32, %c0_i32_0 : i32, i32
  }
  func.func @transform_4(%arg0: i32) -> (i32, i32) {
    %c0_i32 = arith.constant 0 : i32
    %c0_i32_0 = arith.constant 0 : i32
    %c0_i32_1 = arith.constant 0 : i32
    return %c0_i32, %c0_i32_0 : i32, i32
  }
  func.func @transform_5(%arg0: i32) -> (i32, i32) {
    %c0_i32 = arith.constant 0 : i32
    %c0_i32_0 = arith.constant 0 : i32
    return %arg0, %c0_i32 : i32, i32
  }
}

</mosaic_0001>

<bundles_post_ra>
// kernel: tpu_custom_call.1
= control target key start
LH: loop header
LB: loop body
LE: loop exit
PB: predicated region body
PF: predicated region fallthrough
CT: control target
= control target key end

     0   :  { %10 = vsyncpa [#allocation3], 0  ;;  %s557_s0 = inlined_call_operand.hbm [shape: f32[8,64], index: 0, kind: input, shape index: {}]   ;;  %s558_s1 = inlined_call_operand.hbm [shape: f32[64,128], index: 1, kind: input, shape index: {}]   ;;  %s559_s2 = inlined_call_operand.vmem [shape: f32[1,128], index: 2, kind: input, shape index: {}]   ;;  %s560_s3 = inlined_call_operand.hbm [shape: f32[128,256], index: 3, kind: input, shape index: {}]   ;;  %s561_s4 = inlined_call_operand.vmem [shape: f32[1,256], index: 4, kind: input, shape index: {}]   ;;  %s562_s5 = inlined_call_operand.hbm [shape: f32[8,256], index: 5, kind: output, shape index: {}]  }
   0x1   :  { %11 = vsyncpa [#allocation6], 0 }
   0x2   :  { %12 = vsyncpa [#allocation4], 0  ;;  %s462_s18 = smov [#allocation5]   ;;  %s368_s22 = scalar_lea.hbm %s558_s1, 1024 }
   0x3   :  { %s28_s19 = sshll.u32 %s462_s18, 4  ;;  %p369_p0 = scmp.ne.s32.totalorder %s558_s1, %s368_s22  ;;  %s29_s19 = int_to_ptr.vmem [resolvable:$true] %s28_s19 }
   0x4   :  { %p372_p1 = scmp.lt.u32.totalorder %s368_s22, %s558_s1 }
   0x6   :  { %p374_p2 = pnand %p372_p1, %p369_p0 }
   0x8   :  { %377 = shalt.err (!%p374_p2)
}
   0x9   :  { %s378_s27 = scalar_lea.vmem %s29_s19, 1024  ;;  %p383_p4 = scmp.lt.s32.totalorder %s29_s19, %s29_s19 }
   0xa   :  { %p379_p3 = scmp.ne.s32.totalorder %s29_s19, %s378_s27  ;;  %p384_p5 = scmp.lt.s32.totalorder %s378_s27, %s378_s27 }
   0xc   :  { %p385_p6 = por %p384_p5, %p383_p4 }
   0xe   :  { %p386_p7 = pnand %p385_p6, %p379_p3 }
  0x10   :  { %389 = shalt.err (!%p386_p7)
}
  0x11   :  { %s463_s28 = smov 128   ;;  %s464_s29 = smov 8  }
  0x12   :  { %34 = dma.hbm_to_vmem [thread:$0]  %s558_s1, 1024, %s29_s19, [#allocation6], %s463_s28, %s463_s28, %s464_s29  }
  0x13   :  { %s465_s7 = smov [#allocation2]   ;;  %s466_s9 = smov [#allocation7]  }
  0x14   :  { %s19_s8 = sshll.u32 %s465_s7, 4  ;;  %s42_s10 = sshll.u32 %s466_s9, 4  ;;  %s20_s8 = int_to_ptr.vmem [resolvable:$true] %s19_s8  ;;  %s43_s10 = int_to_ptr.vmem [resolvable:$true] %s42_s10 }
  0x15   :  { %s390_s13 = scalar_lea.hbm %s557_s0, 128 }
  0x16   :  { %p391_p8 = scmp.ne.s32.totalorder %s557_s0, %s390_s13  ;;  %p394_p9 = scmp.lt.u32.totalorder %s390_s13, %s557_s0 }
  0x18   :  { %p396_p10 = pnand %p394_p9, %p391_p8 }
  0x1a   :  { %399 = shalt.err (!%p396_p10)
}
  0x1b   :  { %s400_s1 = scalar_lea.vmem %s20_s8, 128  ;;  %p405_p12 = scmp.lt.s32.totalorder %s20_s8, %s20_s8 }
  0x1c   :  { %p401_p11 = scmp.ne.s32.totalorder %s20_s8, %s400_s1  ;;  %p406_p13 = scmp.lt.s32.totalorder %s400_s1, %s400_s1 }
  0x1e   :  { %p407_p0 = por %p406_p13, %p405_p12 }
  0x20   :  { %p408_p1 = pnand %p407_p0, %p401_p11 }
  0x22   :  { %411 = shalt.err (!%p408_p1)
}
  0x23   :  { %22 = dma.hbm_to_vmem [thread:$0]  %s557_s0, 128, %s20_s8, [#allocation3]  }
  0x24   :  { %s412_s22 = scalar_lea.hbm %s560_s3, 4096 }
  0x25   :  { %p413_p2 = scmp.ne.s32.totalorder %s560_s3, %s412_s22  ;;  %p416_p3 = scmp.lt.u32.totalorder %s412_s22, %s560_s3 }
  0x27   :  { %p418_p4 = pnand %p416_p3, %p413_p2 }
  0x29   :  { %421 = shalt.err (!%p418_p4)
}
  0x2a   :  { %s422_s27 = scalar_lea.vmem %s43_s10, 4096  ;;  %p427_p6 = scmp.lt.s32.totalorder %s43_s10, %s43_s10 }
  0x2b   :  { %p423_p5 = scmp.ne.s32.totalorder %s43_s10, %s422_s27  ;;  %p428_p7 = scmp.lt.s32.totalorder %s422_s27, %s422_s27 }
  0x2d   :  { %p429_p8 = por %p428_p7, %p427_p6 }
  0x2f   :  { %p430_p9 = pnand %p429_p8, %p423_p5 }
  0x31   :  { %433 = shalt.err (!%p430_p9)
}
  0x32   :  { %s467_s0 = smov 256   ;;  %s468_s28 = smov 16  }
  0x33   :  { %48 = dma.hbm_to_vmem [thread:$0]  %s560_s3, 4096, %s43_s10, [#allocation6], %s467_s0, %s467_s0, %s468_s28  }
  0x34   :  { %456 = dma.done.wait [#allocation3], 128  }
  0x35   :  { %457 = vsyncadd [#allocation3], 4294967168 }
  0x36   :  { %458 = dma.done.wait [#allocation6], 5120  }
  0x37   :  { %459 = vsyncadd [#allocation6], 4294962176  ;;  %v469_v0 = vmov 0.0|0.0   ;;  %vm470_vm0 = vmmov 0   ;;  %v471_v1 = vmov 0.0   ;;  %v61_v2 = vld [vmem:[#allocation5] sm:$0xff] }
  0x38   :  { %313 = vmatprep.subr.bf16.mxu0 %v469_v0  ;;  %310 = vmatprep.mubr.msk.f32.mxu0 %vm470_vm0, %v471_v1  ;;  %v62_v3 = vld [vmem:[#allocation5 + $0x8] sm:$0xff]  ;;  %v63_v4 = vld [vmem:[#allocation5 + $0x10] sm:$0xff]  ;;  %v64_v6 = vld [vmem:[#allocation5 + $0x18] sm:$0xff]  ;;  %vm108_vm1 = vcmask 523264   ;;  %s472_s9 = smov [#allocation8]  }
  0x39   :  { %258 = vmatprep.mubr.f32.mxu1 %v471_v1  ;;  %v314_v5 = vpack.c.bf16 %v62_v3, %v61_v2  ;;  %v65_v7 = vld [vmem:[#allocation5 + $0x20] sm:$0xff]  ;;  %v66_v8 = vld [vmem:[#allocation5 + $0x28] sm:$0xff]  ;;  %v317_v9 = vpack.c.bf16 %v64_v6, %v63_v4  ;;  %v72_v11 = vld [vmem:[#allocation7 + $0x18] sm:$0xff]  ;;  %v184_v3 = vlaneseq  ;;  %s273_s10 = sshll.u32 %s472_s9, 4  ;;  %s274_s10 = int_to_ptr.vmem [resolvable:$true] %s273_s10 }
  0x3a   :  { %v70_v10 = vld [vmem:[#allocation7 + $0x8] sm:$0xff]  ;;  %v69_v12 = vld [vmem:[#allocation7] sm:$0xff]  ;;  %v71_v14 = vld [vmem:[#allocation7 + $0x10] sm:$0xff]  ;;  %v320_v23 = vpack.c.bf16 %v66_v8, %v65_v7  ;;  %p439_p11 = scmp.lt.s32.totalorder %s274_s10, %s274_s10 }
  0x3b   :  { %315 = vmatpush3.bf16.msra.mxu0 %v314_v5  ;;  %v325_v13 = vpack.c.bf16 %v72_v11, %v70_v10  ;;  %v74_v15 = vld [vmem:[#allocation7 + $0x28] sm:$0xff]  ;;  %v76_v16 = vld [vmem:[#allocation7 + $0x38] sm:$0xff]  ;;  %v327_v17 = vpack.c.bf16 %v71_v14, %v69_v12  ;;  %v73_v19 = vld [vmem:[#allocation7 + $0x20] sm:$0xff]  ;;  %v185_v4 = vshrl.u32 %v184_v3, 7 }
  0x3c   :  { %316 = vmatprep.subr.bf16.mxu0 %v469_v0  ;;  %v329_v18 = vpack.c.bf16 %v76_v16, %v74_v15  ;;  %v75_v20 = vld [vmem:[#allocation7 + $0x30] sm:$0xff]  ;;  %v78_v21 = vld [vmem:[#allocation7 + $0x48] sm:$0xff]  ;;  %v80_v22 = vld [vmem:[#allocation7 + $0x58] sm:$0xff] }
  0x3d   :  { %326 = vmatprep.subr.bf16.mxu1 %v325_v13  ;;  %v67_v24 = vld [vmem:[#allocation5 + $0x30] sm:$0xff]  ;;  %v331_v25 = vpack.c.bf16 %v75_v20, %v73_v19  ;;  %v68_v26 = vld [vmem:[#allocation5 + $0x38] sm:$0xff]  ;;  %v333_v27 = vpack.c.bf16 %v80_v22, %v78_v21  ;;  %v77_v28 = vld [vmem:[#allocation7 + $0x40] sm:$0xff]  ;;  %v186_v5 = vsub.s32 0, %v185_v4  ;;  %v190_v7 = vsub.s32 1, %v185_v4 }
  0x3e   :  { %328 = vmatpush1.bf16.msra.mxu1 %v327_v17  ;;  %v79_v29 = vld [vmem:[#allocation7 + $0x50] sm:$0xff]  ;;  %v82_v30 = vld [vmem:[#allocation7 + $0x68] sm:$0xff]  ;;  %v84_v31 = vld [vmem:[#allocation7 + $0x78] sm:$0xff]  ;;  %v323_v32 = vpack.c.bf16 %v68_v26, %v67_v24 }
  0x3f   :  { %318 = vmatpush3.bf16.msra.mxu0 %v317_v9  ;;  %330 = vmatprep.subr.bf16.mxu1 %v329_v18  ;;  %v335_v33 = vpack.c.bf16 %v79_v29, %v77_v28  ;;  %v337_v34 = vpack.c.bf16 %v84_v31, %v82_v30  ;;  %v81_v35 = vld [vmem:[#allocation7 + $0x60] sm:$0xff]  ;;  %v83_v36 = vld [vmem:[#allocation7 + $0x70] sm:$0xff]  ;;  %v86_v37 = vld [vmem:[#allocation7 + $0x88] sm:$0xff] }
  0x40   :  { %319 = vmatprep.subr.bf16.mxu0 %v469_v0  ;;  %v88_v38 = vld [vmem:[#allocation7 + $0x98] sm:$0xff]  ;;  %v339_v40 = vpack.c.bf16 %v83_v36, %v81_v35  ;;  %v85_v42 = vld [vmem:[#allocation7 + $0x80] sm:$0xff]  ;;  %v87_v43 = vld [vmem:[#allocation7 + $0x90] sm:$0xff] }
  0x41   :  { %v60_v39 = vld [vmem:[#allocation2] sm:$0xff]  ;;  %v341_v41 = vpack.c.bf16 %v88_v38, %v86_v37  ;;  %v90_v44 = vld [vmem:[#allocation7 + $0xa8] sm:$0xff]  ;;  %v343_v46 = vpack.c.bf16 %v87_v43, %v85_v42  ;;  %v89_v48 = vld [vmem:[#allocation7 + $0xa0] sm:$0xff] }
  0x42   :  { %332 = vmatpush1.bf16.msra.mxu1 %v331_v25  ;;  %v92_v45 = vld [vmem:[#allocation7 + $0xb8] sm:$0xff]  ;;  %v91_v49 = vld [vmem:[#allocation7 + $0xb0] sm:$0xff]  ;;  %v94_v50 = vld [vmem:[#allocation7 + $0xc8] sm:$0xff] }
  0x43   :  { %321 = vmatpush3.bf16.msra.mxu0 %v320_v23  ;;  %334 = vmatprep.subr.bf16.mxu1 %v333_v27  ;;  %v345_v47 = vpack.c.bf16 %v92_v45, %v90_v44  ;;  %v96_v51 = vld [vmem:[#allocation7 + $0xd8] sm:$0xff]  ;;  %v347_v52 = vpack.c.bf16 %v91_v49, %v89_v48  ;;  %v93_v54 = vld [vmem:[#allocation7 + $0xc0] sm:$0xff]  ;;  %v95_v55 = vld [vmem:[#allocation7 + $0xd0] sm:$0xff] }
  0x44   :  { %322 = vmatprep.subr.bf16.mxu0 %v469_v0  ;;  %v349_v53 = vpack.c.bf16 %v96_v51, %v94_v50  ;;  %v98_v56 = vld [vmem:[#allocation7 + $0xe8] sm:$0xff]  ;;  %v100_v57 = vld [vmem:[#allocation7 + $0xf8] sm:$0xff]  ;;  %v351_v58 = vpack.c.bf16 %v95_v55, %v93_v54  ;;  %v97_v60 = vld [vmem:[#allocation7 + $0xe0] sm:$0xff] }
  0x45   :  { %v353_v59 = vpack.c.bf16 %v100_v57, %v98_v56  ;;  %v99_v61 = vld [vmem:[#allocation7 + $0xf0] sm:$0xff]  ;;  %v283_v63 = vld [vmem:[%s559_s2] ss:$0 sm:$0xff]  ;;  %s434_s2 = scalar_lea.vmem %s274_s10, 256 }
  0x46   :  { %336 = vmatpush1.bf16.msra.mxu1 %v335_v33  ;;  %v355_v62 = vpack.c.bf16 %v99_v61, %v97_v60  ;;  %v182_v6 = vld [vmem:[%s561_s4] sm:$0x3]  ;;  %p435_p10 = scmp.ne.s32.totalorder %s274_s10, %s434_s2  ;;  %p440_p12 = scmp.lt.s32.totalorder %s434_s2, %s434_s2 }
  0x47   :  { %324 = vmatpush3.bf16.msra.mxu0 %v323_v32  ;;  %338 = vmatprep.subr.bf16.mxu1 %v337_v34  ;;  %v187_v8 = vrot.slane %v182_v6, %v186_v5  ;;  %v191_v9 = vrot.slane %v182_v6, %v190_v7 }
  0x48   :  { %p441_p13 = por %p440_p12, %p439_p11 }
  0x4a   :  { %311 = vmatmul.mubr.msk.f32.vlgmr.msra.gmra.mrb[0].mxu0 %vm108_vm1, %v60_v39  ;;  %340 = vmatpush1.bf16.msra.mxu1 %v339_v40  ;;  %p442_p0 = pnand %p441_p13, %p435_p10 }
  0x4b   :  { %342 = vmatprep.subr.bf16.mxu1 %v341_v41 }
  0x4e   :  { %344 = vmatpush1.bf16.msra.mxu1 %v343_v46 }
  0x4f   :  { %346 = vmatprep.subr.bf16.mxu1 %v345_v47 }
  0x52   :  { %348 = vmatpush1.bf16.msra.mxu1 %v347_v52 }
  0x53   :  { %350 = vmatprep.subr.bf16.mxu1 %v349_v53 }
  0x56   :  { %352 = vmatpush1.bf16.msra.mxu1 %v351_v58 }
  0x57   :  { %354 = vmatprep.subr.bf16.mxu1 %v353_v59 }
  0x5a   :  { %356 = vmatpush1.bf16.msra.mxu1 %v355_v62 }
 0x11d   :  { %v178_v0 = vpop.f32.mrb[0].mxu0 }
 0x11e   :  { %v179_v1 = vadd.f32 %v283_v63, %v178_v0  ;;  %v312_v2 = vpop.f32.mrb[1].mxu0 }
 0x120   :  { %259 = vmatmul.mubr.f32.vlgmr.msra.gmra.mrb[0].mxu1 %v179_v1 }
 0x1f3   :  { %v260_v10 = vpop.f32.mrb[0].mxu1 }
 0x1f4   :  { %v261_v11 = vadd.f32 %v260_v10, %v187_v8  ;;  %v262_v12 = vpop.f32.mrb[1].mxu1 }
 0x1f5   :  { %v263_v13 = vadd.f32 %v262_v12, %v191_v9 }
 0x1f6   :  { %265 = vst [vmem:[#allocation8] sm:$0xff] %v261_v11 }
 0x1f7   :  { %266 = vst [vmem:[#allocation8 + $0x8] sm:$0xff] %v263_v13 }
 0x1f8   :  { %445 = shalt.err (!%p442_p0)
}
 0x1f9   :  { %s446_s12 = scalar_lea.hbm %s562_s5, 256 }
 0x1fa   :  { %p447_p1 = scmp.ne.s32.totalorder %s562_s5, %s446_s12  ;;  %p450_p2 = scmp.lt.u32.totalorder %s446_s12, %s562_s5 }
 0x1fc   :  { %p452_p3 = pnand %p450_p2, %p447_p1 }
 0x1fe   :  { %455 = shalt.err (!%p452_p3)
}
 0x1ff   :  { %276 = dma.vmem_to_hbm [thread:$0]  %s274_s10, 256, %s562_s5, [#allocation4]  }
 0x200   :  { %460 = dma.done.wait [#allocation4], 256  }
 0x201   :  { %461 = vsyncadd [#allocation4], 4294967040 }
 0x202   :  { %280 = vsyncpa [#allocation3], 1 }
 0x203   :  { %281 = vsyncpa [#allocation6], 1 }
 0x204   :  { %282 = vsyncpa [#allocation4], 1 }

</bundles_post_ra>
